<compile_context>
chip_gen: v7x
topology: tpu7x:2x2x1
jax: 0.10.0
libtpu: 0.0.40
codegen_flags: <defaults>
</compile_context>

<pallas_src>
import functools

import jax
import jax.numpy as jnp
from jax.experimental import pallas as pl
from jax.experimental.pallas import tpu as pltpu


def _round_up(x, m):
    return (x + m - 1) // m * m


# ---------------------------------------------------------------------------
# Kernels
# ---------------------------------------------------------------------------
def _fused_linear_sigmoid_kernel(x_ref, w_ref, b_ref, o_ref):
    # Whole K in one tile: single MXU call per (i, j) tile, fused f32 epilogue.
    z = jnp.dot(x_ref[...], w_ref[...], preferred_element_type=jnp.float32)
    z = z + b_ref[...]                       # f32 bias add (v5e-safe epilogue)
    o_ref[...] = jax.nn.sigmoid(z).astype(o_ref.dtype)


def _ktiled_linear_sigmoid_kernel(x_ref, w_ref, b_ref, o_ref, acc_ref):
    # x_ref: (tm, tk) bf16, w_ref: (tk, tn) bf16, b_ref: (1, tn) f32
    k = pl.program_id(2)

    @pl.when(k == 0)
    def _():
        acc_ref[...] = jnp.zeros_like(acc_ref)

    acc_ref[...] += jnp.dot(
        x_ref[...], w_ref[...], preferred_element_type=jnp.float32
    )

    @pl.when(k == pl.num_programs(2) - 1)
    def _():
        z = acc_ref[...] + b_ref[...]        # bias + sigmoid once, in epilogue
        o_ref[...] = jax.nn.sigmoid(z).astype(o_ref.dtype)


# ---------------------------------------------------------------------------
# pallas_call wrapper
# ---------------------------------------------------------------------------
def _vmem_limit_bytes(tm, tn, tk, k_tiled):
    """Guard-rail derived from the actual tile footprint (double/triple buffered)."""
    w_bufs = 3 if k_tiled else 2
    total = (
        2 * tm * tk * 2          # x tiles, bf16, double-buffered
        + w_bufs * tk * tn * 2   # w tiles, bf16
        + 2 * tn * 4             # bias tiles, f32
        + 2 * tm * tn * 4        # output tiles, f32, double-buffered
        + (tm * tn * 4 if k_tiled else 0)   # f32 accumulator scratch
    )
    # 2x safety factor + compiler scratch headroom; stay well under v7x 64 MiB.
    return int(min(48 << 20, max(16 << 20, 2 * total + (4 << 20))))


@functools.partial(jax.jit, static_argnames=("tm", "tn", "tk", "k_tiled"))
def _linear_sigmoid(x_p, w_p, b2d, *, tm, tn, tk, k_tiled):
    Mp, Kp = x_p.shape
    Np = w_p.shape[1]

    if k_tiled:
        grid = (Mp // tm, Np // tn, Kp // tk)
        return pl.pallas_call(
            _ktiled_linear_sigmoid_kernel,
            out_shape=jax.ShapeDtypeStruct((Mp, Np), jnp.float32),
            grid_spec=pltpu.PrefetchScalarGridSpec(
                num_scalar_prefetch=0,
                grid=grid,
                in_specs=[
                    pl.BlockSpec((tm, tk), lambda i, j, k: (i, k)),   # x tile
                    # Only large streamed operand: 3-deep buffering hides the
                    # DMA behind the short per-step MXU work.
                    pl.BlockSpec((tk, tn), lambda i, j, k: (k, j),
                                 pipeline_mode=pl.Buffered(3)),       # w tile
                    pl.BlockSpec((1, tn), lambda i, j, k: (0, j)),    # bias
                ],
                out_specs=pl.BlockSpec((tm, tn), lambda i, j, k: (i, j)),
                scratch_shapes=[pltpu.VMEM((tm, tn), jnp.float32)],
            ),
            compiler_params=pltpu.CompilerParams(
                dimension_semantics=("parallel", "parallel", "arbitrary"),
                vmem_limit_bytes=_vmem_limit_bytes(tm, tn, tk, True),
            ),
        )(x_p, w_p, b2d)

    grid = (Mp // tm, Np // tn)
    return pl.pallas_call(
        _fused_linear_sigmoid_kernel,
        out_shape=jax.ShapeDtypeStruct((Mp, Np), jnp.float32),
        grid_spec=pltpu.PrefetchScalarGridSpec(
            num_scalar_prefetch=0,
            grid=grid,
            in_specs=[
                pl.BlockSpec((tm, tk), lambda i, j: (i, 0)),          # x tile
                pl.BlockSpec((tk, tn), lambda i, j: (0, j)),          # w tile
                pl.BlockSpec((1, tn), lambda i, j: (0, j)),           # bias
            ],
            out_specs=pl.BlockSpec((tm, tn), lambda i, j: (i, j)),
        ),
        compiler_params=pltpu.CompilerParams(
            dimension_semantics=("parallel", "parallel"),
            vmem_limit_bytes=_vmem_limit_bytes(tm, tn, tk, False),
        ),
    )(x_p, w_p, b2d)


# ---------------------------------------------------------------------------
# Module mirror
# ---------------------------------------------------------------------------
class SigmoidPallas:
    """Mirror of the PyTorch Sigmoid module: sigmoid(Linear(n_in, n_out)(x.view(B,-1)))."""

    def __init__(self, n_input, n_output, key):
        self.n_input = n_input
        self.n_output = n_output

        kw, kb = jax.random.split(key)
        bound = 1.0 / float(n_input) ** 0.5
        # Same init family as nn.Linear; stored as (n_in, n_out) so the kernel
        # computes x @ W directly on the MXU.
        self.w_f32 = jax.random.uniform(
            kw, (n_input, n_output), jnp.float32, -bound, bound
        )
        self.b_f32 = jax.random.uniform(kb, (n_output,), jnp.float32, -bound, bound)

        # ---- One-time weight layout (no per-call W pad/cast HBM traffic) ----
        if n_input <= 2048:
            self.Kp = _round_up(n_input, 128)
            self.tk = self.Kp            # single K tile -> fused kernel
            self.k_tiled = False
        else:
            self.tk = 1024               # 256-aligned K tiles (v7x MXU 2x256^2)
            self.Kp = _round_up(n_input, self.tk)
            self.k_tiled = True

        self.Np = _round_up(n_output, 128)   # lane-dense output / weight cols

        w_p = jnp.pad(self.w_f32, ((0, self.Kp - n_input), (0, self.Np - n_output)))
        self.w_pad = w_p.astype(jnp.bfloat16)        # halves weight HBM stream
        b_p = jnp.pad(self.b_f32, (0, self.Np - n_output))
        self.b_pad = b_p.reshape(1, self.Np)         # bias stays f32 (f32 epilogue)

    def __call__(self, x):
        B = x.shape[0]
        x_flat = x.reshape(B, -1)                    # == torch x.view(x.size(0), -1)
        assert x_flat.shape[1] == self.n_input

        # bf16 packs 2 rows per sublane -> round the batch tile to 16, not 8.
        tm = min(256, _round_up(B, 16))
        Mp = _round_up(B, tm)

        # Keep >=2 independent (i, j) tiles when n_out allows so v7x's two
        # TensorCores both get work even at small batch.
        small_batch = (Mp // tm) == 1
        if small_batch and self.Np >= 256:
            tn = 128
        else:
            tn = 256 if self.Np % 256 == 0 else 128

        x_p = x_flat.astype(jnp.bfloat16)
        if Mp != B or self.Kp != self.n_input:
            x_p = jnp.pad(x_p, ((0, Mp - B), (0, self.Kp - self.n_input)))

        out = _linear_sigmoid(
            x_p, self.w_pad, self.b_pad,
            tm=tm, tn=tn, tk=self.tk, k_tiled=self.k_tiled,
        )
        return out[:B, : self.n_output]


# ---------------------------------------------------------------------------
# Demo / self-check
# ---------------------------------------------------------------------------
if __name__ == "__main__":
    key = jax.random.PRNGKey(0)
    k_x, k_p1, k_p2, k_x2 = jax.random.split(key, 4)

    def _ref(model, x_flat):
        # Reference with the same bf16 operand rounding, f32 accumulation.
        z = jnp.dot(
            x_flat.astype(jnp.bfloat16).astype(jnp.float32),
            model.w_f32.astype(jnp.bfloat16).astype(jnp.float32),
            precision=jax.lax.Precision.HIGHEST,
        ) + model.b_f32
        return jax.nn.sigmoid(z)

    # ---- Case 1: fused single-K-tile path (module's demo shape) -------------
    B, C, H, W = 2, 4, 16, 16
    n_input = C * H * W                    # 1024 -> single K tile
    n_output = 32                          # padded to 128 lanes internally
    x = jax.random.normal(k_x, (B, C, H, W), jnp.float32)

    model = SigmoidPallas(n_input, n_output, k_p1)
    y = jax.block_until_ready(model(x))
    assert y.shape == (B, n_output)
    ref1 = _ref(model, x.reshape(B, -1))
    assert jnp.allclose(y, ref1, atol=2e-3, rtol=2e-3)

    # ---- Case 2: K-tiled accumulator path (K > 2048) -------------------------
    n_input2 = 4096                        # exercises the reduction-grid kernel
    x2 = jax.random.normal(k_x2, (B, n_input2), jnp.float32)
    model2 = SigmoidPallas(n_input2, n_output, k_p2)
    y2 = jax.block_until_ready(model2(x2))
    assert y2.shape == (B, n_output)
    ref2 = _ref(model2, x2)
    assert jnp.allclose(y2, ref2, atol=2e-3, rtol=2e-3)

    print("KERNEL_OK")
</pallas_src>

<mosaic_0001>
module attributes {stable_mosaic.version = 11 : i64} {
  func.func @_fused_linear_sigmoid_kernel(%arg0: i32, %arg1: i32, %arg2: memref<16x1024xbf16, #tpu.memory_space<vmem>>, %arg3: memref<1024x128xbf16, #tpu.memory_space<vmem>>, %arg4: memref<1x128xf32, #tpu.memory_space<vmem>>, %arg5: memref<16x128xf32, #tpu.memory_space<vmem>>) attributes {dimension_semantics = [#tpu.dimension_semantics<parallel>, #tpu.dimension_semantics<parallel>], iteration_bounds = array<i64: 1, 1>, scalar_prefetch = 0 : i64, scratch_operands = 0 : i64, tpu.core_type = #tpu.core_type<tc>, window_params = [{transform_indices = @transform_0, window_bounds = array<i64: 16, 1024>}, {transform_indices = @transform_1, window_bounds = array<i64: 1024, 128>}, {transform_indices = @transform_2, window_bounds = array<i64: 1, 128>}, {transform_indices = @transform_3, window_bounds = array<i64: 16, 128>}]} {
    %c0 = arith.constant 0 : index
    %c0_0 = arith.constant 0 : index
    %0 = vector.load %arg2[%c0, %c0_0] : memref<16x1024xbf16, #tpu.memory_space<vmem>>, vector<16x1024xbf16>
    %c0_1 = arith.constant 0 : index
    %c0_2 = arith.constant 0 : index
    %1 = vector.load %arg3[%c0_1, %c0_2] : memref<1024x128xbf16, #tpu.memory_space<vmem>>, vector<1024x128xbf16>
    %cst = arith.constant dense<0.000000e+00> : vector<16x128xf32>
    %2 = tpu.matmul %0, %1, %cst {dimension_numbers = #tpu.dot_dimension_numbers<[1], [0], [0], [1], [0, 0, 1, 1], [], []>} : vector<16x1024xbf16>, vector<1024x128xbf16>, vector<16x128xf32> -> vector<16x128xf32>
    %c0_3 = arith.constant 0 : index
    %c0_4 = arith.constant 0 : index
    %3 = vector.load %arg4[%c0_3, %c0_4] : memref<1x128xf32, #tpu.memory_space<vmem>>, vector<1x128xf32>
    %4 = vector.broadcast %3 : vector<1x128xf32> to vector<16x128xf32>
    %5 = arith.addf %2, %4 : vector<16x128xf32>
    %6 = arith.negf %5 : vector<16x128xf32>
    %7 = math.exp %6 : vector<16x128xf32>
    %cst_5 = arith.constant 1.000000e+00 : f32
    %8 = vector.broadcast %cst_5 : f32 to vector<16x128xf32>
    %9 = arith.addf %8, %7 : vector<16x128xf32>
    %10 = arith.divf %8, %9 : vector<16x128xf32>
    %c0_6 = arith.constant 0 : index
    %c0_7 = arith.constant 0 : index
    %11 = vector.load %arg5[%c0_6, %c0_7] : memref<16x128xf32, #tpu.memory_space<vmem>>, vector<16x128xf32>
    tpu.vector_store %arg5[%c0_6, %c0_7], %10 {strides = array<i32>} : memref<16x128xf32, #tpu.memory_space<vmem>>, vector<16x128xf32>,
    return
  }
  func.func @transform_0(%arg0: i32, %arg1: i32) -> (i32, i32) {
    %c0_i32 = arith.constant 0 : i32
    %c0_i32_0 = arith.constant 0 : i32
    return %arg0, %c0_i32 : i32, i32
  }
  func.func @transform_1(%arg0: i32, %arg1: i32) -> (i32, i32) {
    %c0_i32 = arith.constant 0 : i32
    %c0_i32_0 = arith.constant 0 : i32
    return %c0_i32, %arg1 : i32, i32
  }
  func.func @transform_2(%arg0: i32, %arg1: i32) -> (i32, i32) {
    %c0_i32 = arith.constant 0 : i32
    %c0_i32_0 = arith.constant 0 : i32
    return %c0_i32, %arg1 : i32, i32
  }
  func.func @transform_3(%arg0: i32, %arg1: i32) -> (i32, i32) {
    %c0_i32 = arith.constant 0 : i32
    return %arg0, %arg1 : i32, i32
  }
}

</mosaic_0001>

<bundles_post_ra>
// kernel: _linear_sigmoid.1
= control target key start
LH: loop header
LB: loop body
LE: loop exit
PB: predicated region body
PF: predicated region fallthrough
CT: control target
= control target key end

     0   :  { %8 = vsyncpa [#allocation3], 0  ;;  %s1191_s0 = inlined_call_operand.hbm [shape: bf16[16,1024], index: 0, kind: input, shape index: {}]   ;;  %s1192_s1 = inlined_call_operand.hbm [shape: bf16[1024,128], index: 1, kind: input, shape index: {}]   ;;  %s1193_s2 = inlined_call_operand.vmem [shape: f32[1,128], index: 2, kind: input, shape index: {}]   ;;  %s1194_s3 = inlined_call_operand.hbm [shape: f32[16,128], index: 3, kind: output, shape index: {}]  }
   0x1   :  { %9 = vsyncpa [#allocation6], 0 }
   0x2   :  { %10 = vsyncpa [#allocation4], 0  ;;  %s1123_s12 = smov [#allocation2]   ;;  %s1051_s16 = scalar_lea.hbm %s1191_s0, 1024 }
   0x3   :  { %s16_s13 = sshll.u32 %s1123_s12, 4  ;;  %p1052_p0 = scmp.ne.s32.totalorder %s1191_s0, %s1051_s16  ;;  %s17_s13 = int_to_ptr.vmem [resolvable:$true] %s16_s13 }
   0x4   :  { %p1055_p1 = scmp.lt.u32.totalorder %s1051_s16, %s1191_s0 }
   0x6   :  { %p1057_p2 = pnand %p1055_p1, %p1052_p0 }
   0x8   :  { %1060 = shalt.err (!%p1057_p2)
}
   0x9   :  { %s1061_s21 = scalar_lea.vmem %s17_s13, 1024  ;;  %p1066_p4 = scmp.lt.s32.totalorder %s17_s13, %s17_s13 }
   0xa   :  { %p1062_p3 = scmp.ne.s32.totalorder %s17_s13, %s1061_s21  ;;  %p1067_p5 = scmp.lt.s32.totalorder %s1061_s21, %s1061_s21 }
   0xc   :  { %p1068_p6 = por %p1067_p5, %p1066_p4 }
   0xe   :  { %p1069_p7 = pnand %p1068_p6, %p1062_p3 }
  0x10   :  { %1072 = shalt.err (!%p1069_p7)
}
  0x11   :  { %s1124_s22 = smov 512   ;;  %s1125_s23 = smov 32  }
  0x12   :  { %22 = dma.hbm_to_vmem [thread:$0]  %s1191_s0, 1024, %s17_s13, [#allocation3], %s1124_s22, %s1124_s22, %s1125_s23  }
  0x13   :  { %s1126_s26 = smov [#allocation5]   ;;  %s1073_s30 = scalar_lea.hbm %s1192_s1, 8192 }
  0x14   :  { %s28_s27 = sshll.u32 %s1126_s26, 4  ;;  %p1074_p8 = scmp.ne.s32.totalorder %s1192_s1, %s1073_s30  ;;  %s29_s27 = int_to_ptr.vmem [resolvable:$true] %s28_s27 }
  0x15   :  { %p1077_p9 = scmp.lt.u32.totalorder %s1073_s30, %s1192_s1 }
  0x17   :  { %p1079_p10 = pnand %p1077_p9, %p1074_p8 }
  0x19   :  { %1082 = shalt.err (!%p1079_p10)
}
  0x1a   :  { %s1083_s8 = scalar_lea.vmem %s29_s27, 8192  ;;  %p1088_p12 = scmp.lt.s32.totalorder %s29_s27, %s29_s27 }
  0x1b   :  { %p1084_p11 = scmp.ne.s32.totalorder %s29_s27, %s1083_s8  ;;  %p1089_p13 = scmp.lt.s32.totalorder %s1083_s8, %s1083_s8 }
  0x1d   :  { %p1090_p0 = por %p1089_p13, %p1088_p12 }
  0x1f   :  { %p1091_p1 = pnand %p1090_p0, %p1084_p11 }
  0x21   :  { %1094 = shalt.err (!%p1091_p1)
}
  0x22   :  { %s1127_s0 = smov 64   ;;  %s1128_s9 = smov 4  }
  0x23   :  { %34 = dma.hbm_to_vmem [thread:$0]  %s1192_s1, 8192, %s29_s27, [#allocation6], %s1127_s0, %s1127_s0, %s1128_s9  }
  0x24   :  { %1117 = dma.done.wait [#allocation3], 1024  }
  0x25   :  { %1118 = vsyncadd [#allocation3], 4294966272 }
  0x26   :  { %1119 = dma.done.wait [#allocation6], 8192  }
  0x27   :  { %1120 = vsyncadd [#allocation6], 4294959104  ;;  %v979_v0 = vld [vmem:[#allocation5 + $0x40] sm:$0xff]   ;;  %v983_v4 = vld [vmem:[#allocation5 + $0x48] sm:$0xff]  }
  0x28   :  { %v980_v1 = vld [vmem:[#allocation5 + $0xc0] sm:$0xff]   ;;  %882 = vmatprep.subr.bf16.mxu0 %v979_v0  ;;  %v984_v5 = vld [vmem:[#allocation5 + $0xc8] sm:$0xff]   ;;  %v987_v8 = vld [vmem:[#allocation5 + $0x50] sm:$0xff]  }
  0x29   :  { %v981_v2 = vld [vmem:[#allocation5] sm:$0xff]   ;;  %904 = vmatprep.subr.bf16.mxu1 %v980_v1  ;;  %v985_v6 = vld [vmem:[#allocation5 + $0x8] sm:$0xff]   ;;  %v988_v9 = vld [vmem:[#allocation5 + $0xd0] sm:$0xff]  }
  0x2a   :  { %v982_v3 = vld [vmem:[#allocation5 + $0x80] sm:$0xff]   ;;  %883 = vmatpush3.bf16.msra.mxu0 %v981_v2  ;;  %v986_v7 = vld [vmem:[#allocation5 + $0x88] sm:$0xff]   ;;  %v989_v10 = vld [vmem:[#allocation5 + $0x10] sm:$0xff]  }
  0x2b   :  { %905 = vmatpush3.bf16.msra.mxu1 %v982_v3  ;;  %884 = vmatprep.subr.bf16.mxu0 %v983_v4  ;;  %v990_v11 = vld [vmem:[#allocation5 + $0x90] sm:$0xff]   ;;  %v991_v12 = vld [vmem:[#allocation5 + $0x58] sm:$0xff]   ;;  %v995_v16 = vld [vmem:[#allocation5 + $0x60] sm:$0xff]  }
  0x2c   :  { %906 = vmatprep.subr.bf16.mxu1 %v984_v5  ;;  %v992_v13 = vld [vmem:[#allocation5 + $0xd8] sm:$0xff]   ;;  %v996_v17 = vld [vmem:[#allocation5 + $0xe0] sm:$0xff]   ;;  %v999_v20 = vld [vmem:[#allocation5 + $0x68] sm:$0xff]  }
  0x2d   :  { %v993_v14 = vld [vmem:[#allocation5 + $0x18] sm:$0xff]   ;;  %v997_v18 = vld [vmem:[#allocation5 + $0x20] sm:$0xff]   ;;  %v1000_v21 = vld [vmem:[#allocation5 + $0xe8] sm:$0xff]  }
  0x2e   :  { %885 = vmatpush3.bf16.msra.mxu0 %v985_v6  ;;  %v994_v15 = vld [vmem:[#allocation5 + $0x98] sm:$0xff]   ;;  %v998_v19 = vld [vmem:[#allocation5 + $0xa0] sm:$0xff]   ;;  %v1001_v22 = vld [vmem:[#allocation5 + $0x28] sm:$0xff]  }
  0x2f   :  { %907 = vmatpush3.bf16.msra.mxu1 %v986_v7  ;;  %886 = vmatprep.subr.bf16.mxu0 %v987_v8  ;;  %v1002_v23 = vld [vmem:[#allocation5 + $0xa8] sm:$0xff]   ;;  %v1003_v24 = vld [vmem:[#allocation5 + $0x70] sm:$0xff]   ;;  %v1007_v28 = vld [vmem:[#allocation5 + $0x78] sm:$0xff]  }
  0x30   :  { %908 = vmatprep.subr.bf16.mxu1 %v988_v9  ;;  %v1004_v25 = vld [vmem:[#allocation5 + $0xf0] sm:$0xff]   ;;  %v1008_v29 = vld [vmem:[#allocation5 + $0xf8] sm:$0xff]   ;;  %v44_v32 = vld [vmem:[#allocation2] sm:$0xff] }
  0x31   :  { %v1005_v26 = vld [vmem:[#allocation5 + $0x30] sm:$0xff]   ;;  %v1009_v30 = vld [vmem:[#allocation5 + $0x38] sm:$0xff]   ;;  %v48_v33 = vld [vmem:[#allocation2 + $0x20] sm:$0xff] }
  0x32   :  { %887 = vmatpush3.bf16.msra.mxu0 %v989_v10  ;;  %v1006_v27 = vld [vmem:[#allocation5 + $0xb0] sm:$0xff]   ;;  %v1010_v31 = vld [vmem:[#allocation5 + $0xb8] sm:$0xff]   ;;  %v45_v34 = vld [vmem:[#allocation2 + $0x8] sm:$0xff]  ;;  %v808_v35 = vcombine.low %v44_v32, %v48_v33  ;;  %v809_v36 = vcombine.high %v44_v32, %v48_v33 }
  0x33   :  { %909 = vmatpush3.bf16.msra.mxu1 %v990_v11  ;;  %888 = vmatprep.subr.bf16.mxu0 %v991_v12  ;;  %v49_v37 = vld [vmem:[#allocation2 + $0x28] sm:$0xff]  ;;  %v1011_v40 = vld [vmem:[#allocation5 + $0x140] sm:$0xff]   ;;  %v1019_v48 = vld [vmem:[#allocation5 + $0x150] sm:$0xff]  }
  0x34   :  { %910 = vmatprep.subr.bf16.mxu1 %v992_v13  ;;  %v810_v38 = vcombine.low %v45_v34, %v49_v37  ;;  %v811_v39 = vcombine.high %v45_v34, %v49_v37  ;;  %643 = vmatprep.mubr.bf16.mxu0 %v809_v36  ;;  %v1012_v41 = vld [vmem:[#allocation5 + $0x1c0] sm:$0xff]   ;;  %v1015_v44 = vld [vmem:[#allocation5 + $0x148] sm:$0xff]   ;;  %v1020_v49 = vld [vmem:[#allocation5 + $0x1d0] sm:$0xff]  }
  0x35   :  { %v1013_v42 = vld [vmem:[#allocation5 + $0x100] sm:$0xff]   ;;  %v1016_v45 = vld [vmem:[#allocation5 + $0x1c8] sm:$0xff]   ;;  %v1021_v50 = vld [vmem:[#allocation5 + $0x110] sm:$0xff]  }
  0x36   :  { %889 = vmatpush3.bf16.msra.mxu0 %v993_v14  ;;  %684 = vmatprep.mubr.bf16.mxu1 %v811_v39  ;;  %v1014_v43 = vld [vmem:[#allocation5 + $0x180] sm:$0xff]   ;;  %v1017_v46 = vld [vmem:[#allocation5 + $0x108] sm:$0xff]   ;;  %v1022_v51 = vld [vmem:[#allocation5 + $0x190] sm:$0xff]  }
  0x37   :  { %911 = vmatpush3.bf16.msra.mxu1 %v994_v15  ;;  %890 = vmatprep.subr.bf16.mxu0 %v995_v16  ;;  %v1018_v47 = vld [vmem:[#allocation5 + $0x188] sm:$0xff]   ;;  %v1023_v52 = vld [vmem:[#allocation5 + $0x158] sm:$0xff]   ;;  %v1027_v56 = vld [vmem:[#allocation5 + $0x160] sm:$0xff]  }
  0x38   :  { %912 = vmatprep.subr.bf16.mxu1 %v996_v17  ;;  %v1024_v53 = vld [vmem:[#allocation5 + $0x1d8] sm:$0xff]   ;;  %v1028_v57 = vld [vmem:[#allocation5 + $0x1e0] sm:$0xff]   ;;  %v1031_v60 = vld [vmem:[#allocation5 + $0x168] sm:$0xff]  }
  0x39   :  { %v1025_v54 = vld [vmem:[#allocation5 + $0x118] sm:$0xff]   ;;  %v1029_v58 = vld [vmem:[#allocation5 + $0x120] sm:$0xff]   ;;  %v1032_v61 = vld [vmem:[#allocation5 + $0x1e8] sm:$0xff]  }
  0x3a   :  { %891 = vmatpush3.bf16.msra.mxu0 %v997_v18  ;;  %v1026_v55 = vld [vmem:[#allocation5 + $0x198] sm:$0xff]   ;;  %v1030_v59 = vld [vmem:[#allocation5 + $0x1a0] sm:$0xff]   ;;  %v1033_v62 = vld [vmem:[#allocation5 + $0x128] sm:$0xff]  }
  0x3b   :  { %913 = vmatpush3.bf16.msra.mxu1 %v998_v19  ;;  %892 = vmatprep.subr.bf16.mxu0 %v999_v20  ;;  %v1034_v63 = vld [vmem:[#allocation5 + $0x1a8] sm:$0xff]   ;;  %v1035_v0 = vld [vmem:[#allocation5 + $0x170] sm:$0xff]   ;;  %v1039_v4 = vld [vmem:[#allocation5 + $0x178] sm:$0xff]  }
  0x3c   :  { %914 = vmatprep.subr.bf16.mxu1 %v1000_v21  ;;  %v1036_v1 = vld [vmem:[#allocation5 + $0x1f0] sm:$0xff]   ;;  %v1040_v5 = vld [vmem:[#allocation5 + $0x1f8] sm:$0xff]   ;;  %v807_v18 = vld [vmem:[%s1193_s2] ss:$0 sm:$0xff]  ;;  %s1129_s2 = smov [#allocation7]  }
  0x3d   :  { %v1037_v2 = vld [vmem:[#allocation5 + $0x130] sm:$0xff]   ;;  %v1041_v6 = vld [vmem:[#allocation5 + $0x138] sm:$0xff]   ;;  %s794_s13 = sshll.u32 %s1129_s2, 4  ;;  %s795_s13 = int_to_ptr.vmem [resolvable:$true] %s794_s13 }
  0x3e   :  { %893 = vmatpush3.bf16.msra.mxu0 %v1001_v22  ;;  %v1038_v3 = vld [vmem:[#allocation5 + $0x1b0] sm:$0xff]   ;;  %v1042_v7 = vld [vmem:[#allocation5 + $0x1b8] sm:$0xff]   ;;  %s1095_s14 = scalar_lea.vmem %s795_s13, 256  ;;  %p1100_p3 = scmp.lt.s32.totalorder %s795_s13, %s795_s13 }
  0x3f   :  { %915 = vmatpush3.bf16.msra.mxu1 %v1002_v23  ;;  %894 = vmatprep.subr.bf16.mxu0 %v1003_v24  ;;  %v46_v8 = vld [vmem:[#allocation2 + $0x10] sm:$0xff]  ;;  %v47_v12 = vld [vmem:[#allocation2 + $0x18] sm:$0xff]  ;;  %p1096_p2 = scmp.ne.s32.totalorder %s795_s13, %s1095_s14  ;;  %p1101_p4 = scmp.lt.s32.totalorder %s1095_s14, %s1095_s14 }
  0x40   :  { %916 = vmatprep.subr.bf16.mxu1 %v1004_v25  ;;  %v50_v9 = vld [vmem:[#allocation2 + $0x30] sm:$0xff]  ;;  %v51_v13 = vld [vmem:[#allocation2 + $0x38] sm:$0xff] }
  0x41   :  { %v812_v10 = vcombine.low %v46_v8, %v50_v9  ;;  %v813_v11 = vcombine.high %v46_v8, %v50_v9  ;;  %v814_v14 = vcombine.low %v47_v12, %v51_v13  ;;  %v815_v15 = vcombine.high %v47_v12, %v51_v13  ;;  %p1102_p5 = por %p1101_p4, %p1100_p3 }
  0x42   :  { %895 = vmatpush3.bf16.msra.mxu0 %v1005_v26 }
  0x43   :  { %917 = vmatpush3.bf16.msra.mxu1 %v1006_v27  ;;  %896 = vmatprep.subr.bf16.mxu0 %v1007_v28  ;;  %p1103_p6 = pnand %p1102_p5, %p1096_p2 }
  0x44   :  { %918 = vmatprep.subr.bf16.mxu1 %v1008_v29 }
  0x46   :  { %897 = vmatpush3.bf16.msra.mxu0 %v1009_v30 }
  0x47   :  { %919 = vmatpush3.bf16.msra.mxu1 %v1010_v31  ;;  %926 = vmatprep.subr.bf16.mxu0 %v1011_v40 }
  0x48   :  { %948 = vmatprep.subr.bf16.mxu1 %v1012_v41 }
  0x49   :  { %644 = vmatmul.mubr.bf16.vlgmr.msra.gmra.mrb[0].mxu0 %v808_v35 }
  0x4a   :  { %685 = vmatmul.mubr.bf16.vlgmr.msra.gmra.mrb[0].mxu1 %v810_v38  ;;  %927 = vmatpush3.bf16.msra.mxu0 %v1013_v42 }
  0x4b   :  { %949 = vmatpush3.bf16.msra.mxu1 %v1014_v43  ;;  %928 = vmatprep.subr.bf16.mxu0 %v1015_v44 }
  0x4c   :  { %950 = vmatprep.subr.bf16.mxu1 %v1016_v45  ;;  %725 = vmatprep.mubr.bf16.mxu0 %v813_v11 }
  0x4d   :  { %766 = vmatprep.mubr.bf16.mxu1 %v815_v15 }
  0x4e   :  { %929 = vmatpush3.bf16.msra.mxu0 %v1017_v46 }
  0x4f   :  { %951 = vmatpush3.bf16.msra.mxu1 %v1018_v47  ;;  %930 = vmatprep.subr.bf16.mxu0 %v1019_v48 }
  0x50   :  { %952 = vmatprep.subr.bf16.mxu1 %v1020_v49 }
  0x52   :  { %931 = vmatpush3.bf16.msra.mxu0 %v1021_v50 }
  0x53   :  { %953 = vmatpush3.bf16.msra.mxu1 %v1022_v51  ;;  %932 = vmatprep.subr.bf16.mxu0 %v1023_v52 }
  0x54   :  { %954 = vmatprep.subr.bf16.mxu1 %v1024_v53 }
  0x56   :  { %933 = vmatpush3.bf16.msra.mxu0 %v1025_v54 }
  0x57   :  { %955 = vmatpush3.bf16.msra.mxu1 %v1026_v55  ;;  %934 = vmatprep.subr.bf16.mxu0 %v1027_v56 }
  0x58   :  { %956 = vmatprep.subr.bf16.mxu1 %v1028_v57 }
  0x5a   :  { %935 = vmatpush3.bf16.msra.mxu0 %v1029_v58 }
  0x5b   :  { %957 = vmatpush3.bf16.msra.mxu1 %v1030_v59  ;;  %936 = vmatprep.subr.bf16.mxu0 %v1031_v60 }
  0x5c   :  { %958 = vmatprep.subr.bf16.mxu1 %v1032_v61 }
  0x5e   :  { %937 = vmatpush3.bf16.msra.mxu0 %v1033_v62 }
  0x5f   :  { %959 = vmatpush3.bf16.msra.mxu1 %v1034_v63  ;;  %938 = vmatprep.subr.bf16.mxu0 %v1035_v0 }
  0x60   :  { %960 = vmatprep.subr.bf16.mxu1 %v1036_v1 }
  0x62   :  { %939 = vmatpush3.bf16.msra.mxu0 %v1037_v2 }
  0x63   :  { %961 = vmatpush3.bf16.msra.mxu1 %v1038_v3  ;;  %940 = vmatprep.subr.bf16.mxu0 %v1039_v4 }
  0x64   :  { %962 = vmatprep.subr.bf16.mxu1 %v1040_v5 }
  0x66   :  { %941 = vmatpush3.bf16.msra.mxu0 %v1041_v6 }
  0x67   :  { %963 = vmatpush3.bf16.msra.mxu1 %v1042_v7 }
  0x69   :  { %726 = vmatmul.mubr.bf16.vlgmr.msra.gmra.mrb[4].mxu0 %v812_v10 }
  0x6a   :  { %767 = vmatmul.mubr.bf16.vlgmr.msra.gmra.mrb[4].mxu1 %v814_v14 }
 0x11c   :  { %v898_v16 = vpop.f32.mrb[0].mxu0 }
 0x11d   :  { %v920_v17 = vpop.f32.mrb[0].mxu1  ;;  %v899_v19 = vpop.f32.mrb[1].mxu0 }
 0x11e   :  { %v900_v20 = vadd.f32 %v899_v19, %v898_v16  ;;  %v921_v21 = vpop.f32.mrb[1].mxu1  ;;  %v901_v22 = vpop.f32.mrb[2].mxu0 }
 0x11f   :  { %v922_v23 = vadd.f32 %v921_v21, %v920_v17  ;;  %v923_v24 = vpop.f32.mrb[2].mxu1  ;;  %v902_v25 = vpop.f32.mrb[3].mxu0 }
 0x120   :  { %v646_v26 = vadd.f32 %v900_v20, %v807_v18  ;;  %v903_v27 = vadd.f32 %v902_v25, %v901_v22  ;;  %v924_v28 = vpop.f32.mrb[3].mxu1 }
 0x121   :  { %v925_v29 = vadd.f32 %v924_v28, %v923_v24 }
 0x122   :  { %v687_v30 = vadd.f32 %v922_v23, %v646_v26  ;;  %v649_v31 = vadd.f32 %v903_v27, %v807_v18 }
 0x124   :  { %v690_v32 = vadd.f32 %v925_v29, %v649_v31 }
 0x13c   :  { %v942_v33 = vpop.f32.mrb[4].mxu0 }
 0x13d   :  { %v964_v34 = vpop.f32.mrb[4].mxu1  ;;  %v943_v35 = vpop.f32.mrb[5].mxu0 }
 0x13e   :  { %v944_v36 = vadd.f32 %v943_v35, %v942_v33  ;;  %v965_v37 = vpop.f32.mrb[5].mxu1  ;;  %v945_v38 = vpop.f32.mrb[6].mxu0 }
 0x13f   :  { %v966_v39 = vadd.f32 %v965_v37, %v964_v34  ;;  %v967_v40 = vpop.f32.mrb[6].mxu1  ;;  %v946_v41 = vpop.f32.mrb[7].mxu0 }
 0x140   :  { %v728_v42 = vadd.f32 %v944_v36, %v687_v30  ;;  %v947_v43 = vadd.f32 %v946_v41, %v945_v38  ;;  %v968_v44 = vpop.f32.mrb[7].mxu1 }
 0x141   :  { %v969_v45 = vadd.f32 %v968_v44, %v967_v40 }
 0x142   :  { %v769_v46 = vadd.f32 %v966_v39, %v728_v42  ;;  %v731_v47 = vadd.f32 %v947_v43, %v690_v32 }
 0x144   :  { %v880_v48 = vmul.f32 -1.442695, %v769_v46  ;;  %v772_v49 = vadd.f32 %v969_v45, %v731_v47 }
 0x146   :  { %1043 = vpow2.f32 %v880_v48  ;;  %v881_v50 = vmul.f32 -1.442695, %v772_v49 }
 0x148   :  { %1045 = vpow2.f32 %v881_v50 }
 0x150   :  { %v1044_v51 = vpop.eup %1043 }
 0x151   :  { %v781_v52 = vadd.f32 1.0, %v1044_v51 }
 0x152   :  { %v1046_v53 = vpop.eup %1045 }
 0x153   :  { %1047 = vrcp.f32 %v781_v52  ;;  %v782_v54 = vadd.f32 1.0, %v1046_v53 }
 0x155   :  { %1049 = vrcp.f32 %v782_v54 }
 0x15d   :  { %v1048_v55 = vpop.eup %1047 }
 0x15e   :  { %787 = vst [vmem:[#allocation7] sm:$0xff] %v1048_v55 }
 0x15f   :  { %v1050_v56 = vpop.eup %1049 }
 0x160   :  { %788 = vst [vmem:[#allocation7 + $0x8] sm:$0xff] %v1050_v56 }
 0x161   :  { %1106 = shalt.err (!%p1103_p6)
}
 0x162   :  { %s1107_s17 = scalar_lea.hbm %s1194_s3, 256 }
 0x163   :  { %p1108_p7 = scmp.ne.s32.totalorder %s1194_s3, %s1107_s17  ;;  %p1111_p8 = scmp.lt.u32.totalorder %s1107_s17, %s1194_s3 }
 0x165   :  { %p1113_p9 = pnand %p1111_p8, %p1108_p7 }
 0x167   :  { %1116 = shalt.err (!%p1113_p9)
}
 0x168   :  { %s1130_s22 = smov 128   ;;  %s1131_s23 = smov 8  }
 0x169   :  { %800 = dma.vmem_to_hbm [thread:$0]  %s795_s13, 256, %s1194_s3, [#allocation4], %s1130_s22, %s1130_s22, %s1131_s23  }
 0x16a   :  { %1121 = dma.done.wait [#allocation4], 256  }
 0x16b   :  { %1122 = vsyncadd [#allocation4], 4294967040 }
 0x16c   :  { %804 = vsyncpa [#allocation3], 1 }
 0x16d   :  { %805 = vsyncpa [#allocation6], 1 }
 0x16e   :  { %806 = vsyncpa [#allocation4], 1 }

</bundles_post_ra>
